<compile_context>
chip_gen: v6e
topology: v6e:2x2x1
jax: 0.10.0
libtpu: 0.0.40
codegen_flags: <defaults>
</compile_context>

<pallas_src>
import functools

import jax
import jax.numpy as jnp
from jax.experimental import pallas as pl
from jax.experimental.pallas import tpu as pltpu


_LANES = 128       # TPU lane width (last vreg dim)
_TILE_ROWS = 4096  # max rows streamed per grid step (shrunk by the VMEM budget below)


def _cdiv(a, b):
    return (a + b - 1) // b


def _round_up(x, m):
    return _cdiv(x, m) * m


def _pick_rows(rows, cap):
    """Row-tile: full dim for tiny arrays (no sublane constraint), else multiple of 8."""
    if rows <= 8:
        return rows
    return min(cap, _round_up(rows, 8))


def _num_tensorcores():
    """1 for single-TC chips (v5e/v6e); 2 for megacore chips. Falls back to 2 (always safe)."""
    try:
        kind = jax.devices()[0].device_kind.lower()
    except Exception:
        return 2
    if any(tag in kind for tag in ("v5 lite", "v5e", "v6 lite", "v6e")):
        return 1
    return 2


def _custom_loss_kernel(logits_ref, tgt_ref, probs_ref, wt_ref, out_ref,
                        ce_acc, bce_acc, *, n_ce, n_bce_rows, inv_n_ce, inv_n_bce):
    o = pl.program_id(0)
    i = pl.program_id(1)
    step = o * pl.num_programs(1) + i   # global step; matches the (clamped) index maps

    @pl.when(i == 0)
    def _init():
        ce_acc[...] = jnp.zeros_like(ce_acc)
        bce_acc[...] = jnp.zeros_like(bce_acc)

    # ---- CrossEntropyLoss partial sums (lane-wide (1, C) accumulator) ----
    logits = logits_ref[...].astype(jnp.float32)                     # (Tce, C)
    tgt = tgt_ref[...]                                               # (Tce, 1) int32
    tce = logits.shape[0]
    row = step * tce + jax.lax.broadcasted_iota(jnp.int32, (tce, 1), 0)
    valid = row < n_ce                                               # masks ragged tail + overrun steps

    m = jnp.max(logits, axis=-1, keepdims=True)
    lse = m + jnp.log(jnp.sum(jnp.exp(logits - m), axis=-1, keepdims=True))
    col = jax.lax.broadcasted_iota(jnp.int32, logits.shape, 1)
    # Spread lse into column 0 and subtract the picked logit; the total sum over the block
    # equals sum_i (lse_i - b[i, bt_i]) for valid rows.  (No one-hot multiply, no 0*inf NaN.)
    contrib = jnp.where(col == 0, lse, 0.0) - jnp.where(col == tgt, logits, 0.0)
    contrib = jnp.where(valid, contrib, 0.0)
    ce_acc[...] += jnp.sum(contrib, axis=0, keepdims=True)           # sublane reduce only

    # ---- BCELoss partial sums (lane-wide (1, cols) accumulator) ----
    p = probs_ref[...].astype(jnp.float32)                           # (Tb, cols)
    t = wt_ref[...].astype(jnp.float32)
    tb = p.shape[0]
    rowb = step * tb + jax.lax.broadcasted_iota(jnp.int32, (tb, 1), 0)
    validb = rowb < n_bce_rows
    # Keep PyTorch's exact clamp semantics: log(p) and log(1-p) clamped at -100.
    log_p = jnp.maximum(jnp.log(p), -100.0)
    log_1mp = jnp.maximum(jnp.log(1.0 - p), -100.0)
    bce_el = -(t * log_p + (1.0 - t) * log_1mp)
    bce_el = jnp.where(validb, bce_el, 0.0)                          # zero out invalid rows
    bce_acc[...] += jnp.sum(bce_el, axis=0, keepdims=True)           # sublane reduce only

    @pl.when(i == pl.num_programs(1) - 1)
    def _finalize():
        ce_tot = jnp.sum(ce_acc[...], keepdims=True)                 # single cross-lane reduce
        bce_tot = jnp.sum(bce_acc[...], keepdims=True)
        res = ce_tot * inv_n_ce + bce_tot * inv_n_bce                # (1, 1) per-core partial
        out_ref[...] = jnp.broadcast_to(res, out_ref.shape)          # lane-dense (8, 128) store


def custom_loss(b, bt, w, wt):
    """b: (N, C) logits; bt: (N,) int class ids; w, wt: same-shape probs/targets in (0,1)."""
    n, c = map(int, b.shape)
    n_bce = int(w.size)
    if n == 0 or n_bce == 0:
        return jnp.array(jnp.nan, jnp.float32)   # PyTorch mean over empty -> nan

    # ---- BCE operands: free (bitcast) reshape to a 2-D lane-friendly view; no pad copies ----
    if n_bce % _LANES == 0:
        w2, wt2 = w.reshape(-1, _LANES), wt.reshape(-1, _LANES)
    elif w.ndim >= 2:
        w2, wt2 = w.reshape(-1, w.shape[-1]), wt.reshape(-1, wt.shape[-1])
    else:
        w2, wt2 = w.reshape(-1, 1), wt.reshape(-1, 1)
    bce_rows, bce_cols = map(int, w2.shape)

    bt2 = bt.reshape(-1, 1).astype(jnp.int32)    # (N, 1); cast is a no-op for int32 inputs

    ncores = _num_tensorcores()

    # ---- Row tiles sized against a conservative cross-generation VMEM budget ----
    tile_ce = _pick_rows(n, _TILE_ROWS)
    tile_b = _pick_rows(bce_rows, _TILE_ROWS)
    # Per-row VMEM bytes (lane-padded blocks; the (tile,1) int32 target block pads to 128 lanes).
    bytes_ce_row = _round_up(c, _LANES) * b.dtype.itemsize + _LANES * 4
    bytes_b_row = _round_up(bce_cols, _LANES) * (w.dtype.itemsize + wt.dtype.itemsize)
    budget = 20 * 1024 * 1024                      # double-buffered per-step footprint target
    while (2 * (tile_ce * bytes_ce_row + tile_b * bytes_b_row) > budget
           and (tile_ce > 8 or tile_b > 8)):
        if tile_ce * bytes_ce_row >= tile_b * bytes_b_row and tile_ce > 8:
            tile_ce = max(8, (tile_ce // 16) * 8)
        elif tile_b > 8:
            tile_b = max(8, (tile_b // 16) * 8)
        else:
            tile_ce = max(8, (tile_ce // 16) * 8)

    nblk_ce = _cdiv(n, tile_ce)
    nblk_b = _cdiv(bce_rows, tile_b)
    steps = max(nblk_ce, nblk_b)
    inner = _cdiv(steps, ncores)

    # Clamp block indices so no DMA ever goes past the array; overrun steps are masked
    # in-kernel by the global-row test and contribute exactly zero.
    def _ce_map(o, i, _inner=inner, _last=nblk_ce - 1):
        return (jnp.minimum(o * _inner + i, _last), 0)

    def _bce_map(o, i, _inner=inner, _last=nblk_b - 1):
        return (jnp.minimum(o * _inner + i, _last), 0)

    kernel = functools.partial(
        _custom_loss_kernel,
        n_ce=n, n_bce_rows=bce_rows,
        inv_n_ce=1.0 / float(n),      # true divisors, never padded counts
        inv_n_bce=1.0 / float(n_bce))

    cost = pl.CostEstimate(
        flops=6 * int(b.size) + 8 * n_bce,
        transcendentals=int(b.size) + n + 2 * n_bce,
        bytes_accessed=(int(b.size) * b.dtype.itemsize + n * 4
                        + n_bce * (w.dtype.itemsize + wt.dtype.itemsize)
                        + ncores * 8 * _LANES * 4),
    )

    out = pl.pallas_call(
        kernel,
        out_shape=jax.ShapeDtypeStruct((ncores * 8, _LANES), jnp.float32),
        grid=(ncores, inner),
        in_specs=[
            pl.BlockSpec((tile_ce, c), _ce_map),            # logits
            pl.BlockSpec((tile_ce, 1), _ce_map),            # CE targets
            pl.BlockSpec((tile_b, bce_cols), _bce_map),     # BCE probs
            pl.BlockSpec((tile_b, bce_cols), _bce_map),     # BCE targets
        ],
        out_specs=pl.BlockSpec((8, _LANES), lambda o, i: (o, 0)),   # per-core partial
        scratch_shapes=[pltpu.VMEM((1, c), jnp.float32),            # CE lane-wide accumulator
                        pltpu.VMEM((1, bce_cols), jnp.float32)],    # BCE lane-wide accumulator
        compiler_params=pltpu.CompilerParams(
            dimension_semantics=("parallel", "arbitrary"),
            vmem_limit_bytes=32 * 1024 * 1024),
        cost_estimate=cost,
    )(b, bt2, w2, wt2)

    # One partial per core (broadcast across its (8,128) block): take element [0,0] of each.
    return jnp.sum(out[0::8, 0])


if __name__ == "__main__":
    key = jax.random.PRNGKey(0)
    k1, k2, k3, k4 = jax.random.split(key, 4)

    N, C, D = 8, 32, 16
    # CrossEntropy inputs: logits + integer class targets.
    b = jax.random.normal(k1, (N, C), dtype=jnp.float32)
    bt = jax.random.randint(k2, (N,), 0, C, dtype=jnp.int32)
    # BCE inputs: probabilities in (0,1) and soft targets in (0,1).
    w = jax.nn.sigmoid(jax.random.normal(k3, (N, D), dtype=jnp.float32))
    wt = jax.nn.sigmoid(jax.random.normal(k4, (N, D), dtype=jnp.float32))

    loss = custom_loss(b, bt, w, wt)
    jax.block_until_ready(loss)

    # Pure-JAX reference check (CE + BCE, both mean-reduced).
    lse = jax.scipy.special.logsumexp(b, axis=-1)
    ce_ref = jnp.mean(lse - b[jnp.arange(N), bt])
    bce_ref = jnp.mean(-(wt * jnp.log(w) + (1.0 - wt) * jnp.log(1.0 - w)))
    ref = ce_ref + bce_ref
    assert jnp.allclose(loss, ref, rtol=1e-5, atol=1e-5), (loss, ref)

    print("KERNEL_OK")
</pallas_src>

<mosaic_0001>
module attributes {stable_mosaic.version = 11 : i64} {
  func.func @_custom_loss_kernel(%arg0: i32, %arg1: i32, %arg2: memref<8x32xf32, #tpu.memory_space<vmem>>, %arg3: memref<8x1xi32, #tpu.memory_space<vmem>>, %arg4: memref<1x128xf32, #tpu.memory_space<vmem>>, %arg5: memref<1x128xf32, #tpu.memory_space<vmem>>, %arg6: memref<8x128xf32, #tpu.memory_space<vmem>>, %arg7: memref<1x32xf32, #tpu.memory_space<vmem>>, %arg8: memref<1x128xf32, #tpu.memory_space<vmem>>) attributes {dimension_semantics = [#tpu.dimension_semantics<parallel>, #tpu.dimension_semantics<arbitrary>], iteration_bounds = array<i64: 2, 1>, scalar_prefetch = 0 : i64, scratch_operands = 2 : i64, tpu.core_type = #tpu.core_type<tc>, window_params = [{transform_indices = @transform_0, window_bounds = array<i64: 8, 32>}, {transform_indices = @transform_1, window_bounds = array<i64: 8, 1>}, {transform_indices = @transform_2, window_bounds = array<i64: 1, 128>}, {transform_indices = @transform_3, window_bounds = array<i64: 1, 128>}, {transform_indices = @transform_4, window_bounds = array<i64: 8, 128>}]} {
    %c1_i32 = arith.constant 1 : i32
    %0 = arith.muli %arg0, %c1_i32 : i32
    %1 = arith.addi %0, %arg1 : i32
    %c0_i32 = arith.constant 0 : i32
    %2 = arith.cmpi eq, %arg1, %c0_i32 : i32
    %3 = arith.extui %2 : i1 to i32
    %c0_i32_0 = arith.constant 0 : i32
    %4 = arith.cmpi ne, %3, %c0_i32_0 : i32
    scf.if %4 {
      %cst_34 = arith.constant 0.000000e+00 : f32
      %78 = vector.broadcast %cst_34 : f32 to vector<1x32xf32>
      %c0_35 = arith.constant 0 : index
      %c0_36 = arith.constant 0 : index
      %79 = vector.load %arg7[%c0_35, %c0_36] : memref<1x32xf32, #tpu.memory_space<vmem>>, vector<1x32xf32>
      tpu.vector_store %arg7[%c0_35, %c0_36], %78 {strides = array<i32>} : memref<1x32xf32, #tpu.memory_space<vmem>>, vector<1x32xf32>,
      %cst_37 = arith.constant 0.000000e+00 : f32
      %80 = vector.broadcast %cst_37 : f32 to vector<1x128xf32>
      %c0_38 = arith.constant 0 : index
      %c0_39 = arith.constant 0 : index
      %81 = vector.load %arg8[%c0_38, %c0_39] : memref<1x128xf32, #tpu.memory_space<vmem>>, vector<1x128xf32>
      tpu.vector_store %arg8[%c0_38, %c0_39], %80 {strides = array<i32>} : memref<1x128xf32, #tpu.memory_space<vmem>>, vector<1x128xf32>,
    } else {
    }
    %c0 = arith.constant 0 : index
    %c0_1 = arith.constant 0 : index
    %5 = vector.load %arg2[%c0, %c0_1] : memref<8x32xf32, #tpu.memory_space<vmem>>, vector<8x32xf32>
    %c0_2 = arith.constant 0 : index
    %c0_3 = arith.constant 0 : index
    %6 = vector.load %arg3[%c0_2, %c0_3] : memref<8x1xi32, #tpu.memory_space<vmem>>, vector<8x1xi32>
    %c8_i32 = arith.constant 8 : i32
    %7 = arith.muli %1, %c8_i32 : i32
    %8 = tpu.iota {dimensions = array<i32: 0>} : vector<8x1xi32>
    %9 = vector.broadcast %7 : i32 to vector<8x1xi32>
    %10 = arith.addi %9, %8 : vector<8x1xi32>
    %c8_i32_4 = arith.constant 8 : i32
    %11 = vector.broadcast %c8_i32_4 : i32 to vector<8x1xi32>
    %12 = arith.cmpi slt, %10, %11 : vector<8x1xi32>
    %cst = arith.constant dense<0xFF800000> : vector<8xf32>
    %13 = vector.multi_reduction <maximumf>, %5, %cst [1] : vector<8x32xf32> to vector<8xf32>
    %14 = vector.shape_cast %13 : vector<8xf32> to vector<8x1xf32>
    %15 = vector.broadcast %14 : vector<8x1xf32> to vector<8x32xf32>
    %16 = arith.subf %5, %15 : vector<8x32xf32>
    %17 = math.exp %16 : vector<8x32xf32>
    %cst_5 = arith.constant dense<0.000000e+00> : vector<8xf32>
    %18 = vector.multi_reduction <add>, %17, %cst_5 [1] : vector<8x32xf32> to vector<8xf32>
    %19 = vector.shape_cast %18 : vector<8xf32> to vector<8x1xf32>
    %20 = math.log %19 : vector<8x1xf32>
    %21 = arith.addf %14, %20 : vector<8x1xf32>
    %22 = tpu.iota {dimensions = array<i32: 1>} : vector<8x32xi32>
    %c0_i32_6 = arith.constant 0 : i32
    %23 = vector.broadcast %c0_i32_6 : i32 to vector<8x32xi32>
    %24 = arith.cmpi eq, %22, %23 : vector<8x32xi32>
    %cst_7 = arith.constant 0.000000e+00 : f32
    %25 = vector.shape_cast %21 : vector<8x1xf32> to vector<8x1xf32>
    %26 = vector.broadcast %25 : vector<8x1xf32> to vector<8x32xf32>
    %27 = vector.broadcast %cst_7 : f32 to vector<8x32xf32>
    %28 = arith.select %24, %26, %27 : vector<8x32xi1>, vector<8x32xf32>
    %29 = vector.broadcast %6 : vector<8x1xi32> to vector<8x32xi32>
    %30 = arith.cmpi eq, %22, %29 : vector<8x32xi32>
    %cst_8 = arith.constant 0.000000e+00 : f32
    %31 = vector.broadcast %cst_8 : f32 to vector<8x32xf32>
    %32 = arith.select %30, %5, %31 : vector<8x32xi1>, vector<8x32xf32>
    %33 = arith.subf %28, %32 : vector<8x32xf32>
    %cst_9 = arith.constant 0.000000e+00 : f32
    %34 = vector.shape_cast %12 : vector<8x1xi1> to vector<8x1xi1>
    %35 = vector.broadcast %34 : vector<8x1xi1> to vector<8x32xi1>
    %36 = vector.broadcast %cst_9 : f32 to vector<8x32xf32>
    %37 = arith.select %35, %33, %36 : vector<8x32xi1>, vector<8x32xf32>
    %c0_10 = arith.constant 0 : index
    %c0_11 = arith.constant 0 : index
    %38 = vector.load %arg7[%c0_10, %c0_11] : memref<1x32xf32, #tpu.memory_space<vmem>>, vector<1x32xf32>
    %cst_12 = arith.constant dense<0.000000e+00> : vector<32xf32>
    %39 = vector.multi_reduction <add>, %37, %cst_12 [0] : vector<8x32xf32> to vector<32xf32>
    %40 = vector.shape_cast %39 : vector<32xf32> to vector<1x32xf32>
    %41 = arith.addf %38, %40 : vector<1x32xf32>
    %c0_13 = arith.constant 0 : index
    %c0_14 = arith.constant 0 : index
    %42 = vector.load %arg7[%c0_13, %c0_14] : memref<1x32xf32, #tpu.memory_space<vmem>>, vector<1x32xf32>
    tpu.vector_store %arg7[%c0_13, %c0_14], %41 {strides = array<i32>} : memref<1x32xf32, #tpu.memory_space<vmem>>, vector<1x32xf32>,
    %c0_15 = arith.constant 0 : index
    %c0_16 = arith.constant 0 : index
    %43 = vector.load %arg4[%c0_15, %c0_16] : memref<1x128xf32, #tpu.memory_space<vmem>>, vector<1x128xf32>
    %c0_17 = arith.constant 0 : index
    %c0_18 = arith.constant 0 : index
    %44 = vector.load %arg5[%c0_17, %c0_18] : memref<1x128xf32, #tpu.memory_space<vmem>>, vector<1x128xf32>
    %c1_i32_19 = arith.constant 1 : i32
    %45 = arith.muli %1, %c1_i32_19 : i32
    %46 = tpu.iota {dimensions = array<i32: 0>} : vector<1x1xi32>
    %47 = vector.broadcast %45 : i32 to vector<1x1xi32>
    %48 = arith.addi %47, %46 : vector<1x1xi32>
    %c1_i32_20 = arith.constant 1 : i32
    %49 = vector.broadcast %c1_i32_20 : i32 to vector<1x1xi32>
    %50 = arith.cmpi slt, %48, %49 : vector<1x1xi32>
    %51 = math.log %43 : vector<1x128xf32>
    %cst_21 = arith.constant -1.000000e+02 : f32
    %52 = vector.broadcast %cst_21 : f32 to vector<1x128xf32>
    %53 = arith.maximumf %51, %52 : vector<1x128xf32>
    %cst_22 = arith.constant 1.000000e+00 : f32
    %54 = vector.broadcast %cst_22 : f32 to vector<1x128xf32>
    %55 = arith.subf %54, %43 : vector<1x128xf32>
    %56 = math.log %55 : vector<1x128xf32>
    %cst_23 = arith.constant -1.000000e+02 : f32
    %57 = vector.broadcast %cst_23 : f32 to vector<1x128xf32>
    %58 = arith.maximumf %56, %57 : vector<1x128xf32>
    %59 = arith.mulf %44, %53 : vector<1x128xf32>
    %cst_24 = arith.constant 1.000000e+00 : f32
    %60 = vector.broadcast %cst_24 : f32 to vector<1x128xf32>
    %61 = arith.subf %60, %44 : vector<1x128xf32>
    %62 = arith.mulf %61, %58 : vector<1x128xf32>
    %63 = arith.addf %59, %62 : vector<1x128xf32>
    %cst_25 = arith.constant 0.000000e+00 : f32
    %64 = vector.broadcast %cst_25 : f32 to vector<1x128xf32>
    %65 = arith.subf %64, %63 : vector<1x128xf32>
    %cst_26 = arith.constant 0.000000e+00 : f32
    %66 = vector.shape_cast %50 : vector<1x1xi1> to vector<1x1xi1>
    %67 = vector.broadcast %66 : vector<1x1xi1> to vector<1x128xi1>
    %68 = vector.broadcast %cst_26 : f32 to vector<1x128xf32>
    %69 = arith.select %67, %65, %68 : vector<1x128xi1>, vector<1x128xf32>
    %c0_27 = arith.constant 0 : index
    %c0_28 = arith.constant 0 : index
    %70 = vector.load %arg8[%c0_27, %c0_28] : memref<1x128xf32, #tpu.memory_space<vmem>>, vector<1x128xf32>
    %cst_29 = arith.constant dense<0.000000e+00> : vector<128xf32>
    %71 = vector.multi_reduction <add>, %69, %cst_29 [0] : vector<1x128xf32> to vector<128xf32>
    %72 = vector.shape_cast %71 : vector<128xf32> to vector<1x128xf32>
    %73 = arith.addf %70, %72 : vector<1x128xf32>
    %c0_30 = arith.constant 0 : index
    %c0_31 = arith.constant 0 : index
    %74 = vector.load %arg8[%c0_30, %c0_31] : memref<1x128xf32, #tpu.memory_space<vmem>>, vector<1x128xf32>
    tpu.vector_store %arg8[%c0_30, %c0_31], %73 {strides = array<i32>} : memref<1x128xf32, #tpu.memory_space<vmem>>, vector<1x128xf32>,
    %c0_i32_32 = arith.constant 0 : i32
    %75 = arith.cmpi eq, %arg1, %c0_i32_32 : i32
    %76 = arith.extui %75 : i1 to i32
    %c0_i32_33 = arith.constant 0 : i32
    %77 = arith.cmpi ne, %76, %c0_i32_33 : i32
    scf.if %77 {
      %c0_34 = arith.constant 0 : index
      %c0_35 = arith.constant 0 : index
      %78 = vector.load %arg7[%c0_34, %c0_35] : memref<1x32xf32, #tpu.memory_space<vmem>>, vector<1x32xf32>
      %79 = vector.shape_cast %78 : vector<1x32xf32> to vector<1x1x32xf32>
      %cst_36 = arith.constant dense<0.000000e+00> : vector<1xf32>
      %80 = vector.multi_reduction <add>, %79, %cst_36 [1, 2] : vector<1x1x32xf32> to vector<1xf32>
      %81 = vector.shape_cast %80 : vector<1xf32> to vector<1x1x1xf32>
      %82 = vector.extract %81[0, 0, 0] : f32 from vector<1x1x1xf32>
      %83 = vector.broadcast %82 : f32 to vector<1x1xf32>
      %c0_37 = arith.constant 0 : index
      %c0_38 = arith.constant 0 : index
      %84 = vector.load %arg8[%c0_37, %c0_38] : memref<1x128xf32, #tpu.memory_space<vmem>>, vector<1x128xf32>
      %85 = vector.shape_cast %84 : vector<1x128xf32> to vector<1x1x128xf32>
      %cst_39 = arith.constant dense<0.000000e+00> : vector<1xf32>
      %86 = vector.multi_reduction <add>, %85, %cst_39 [1, 2] : vector<1x1x128xf32> to vector<1xf32>
      %87 = vector.shape_cast %86 : vector<1xf32> to vector<1x1x1xf32>
      %88 = vector.extract %87[0, 0, 0] : f32 from vector<1x1x1xf32>
      %89 = vector.broadcast %88 : f32 to vector<1x1xf32>
      %cst_40 = arith.constant 1.250000e-01 : f32
      %90 = vector.broadcast %cst_40 : f32 to vector<1x1xf32>
      %91 = arith.mulf %83, %90 : vector<1x1xf32>
      %cst_41 = arith.constant 7.812500e-03 : f32
      %92 = vector.broadcast %cst_41 : f32 to vector<1x1xf32>
      %93 = arith.mulf %89, %92 : vector<1x1xf32>
      %94 = arith.addf %91, %93 : vector<1x1xf32>
      %95 = vector.shape_cast %94 : vector<1x1xf32> to vector<1x1xf32>
      %96 = vector.broadcast %95 : vector<1x1xf32> to vector<8x128xf32>
      %c0_42 = arith.constant 0 : index
      %c0_43 = arith.constant 0 : index
      %97 = vector.load %arg6[%c0_42, %c0_43] : memref<8x128xf32, #tpu.memory_space<vmem>>, vector<8x128xf32>
      tpu.vector_store %arg6[%c0_42, %c0_43], %96 {strides = array<i32>} : memref<8x128xf32, #tpu.memory_space<vmem>>, vector<8x128xf32>,
    } else {
    }
    return
  }
  func.func @transform_0(%arg0: i32, %arg1: i32) -> (i32, i32) {
    %c1_i32 = arith.constant 1 : i32
    %0 = arith.muli %arg0, %c1_i32 : i32
    %1 = arith.addi %0, %arg1 : i32
    %c0_i32 = arith.constant 0 : i32
    %2 = arith.minsi %1, %c0_i32 : i32
    %c0_i32_0 = arith.constant 0 : i32
    %c0_i32_1 = arith.constant 0 : i32
    return %2, %c0_i32_0 : i32, i32
  }
  func.func @transform_1(%arg0: i32, %arg1: i32) -> (i32, i32) {
    %c1_i32 = arith.constant 1 : i32
    %0 = arith.muli %arg0, %c1_i32 : i32
    %1 = arith.addi %0, %arg1 : i32
    %c0_i32 = arith.constant 0 : i32
    %2 = arith.minsi %1, %c0_i32 : i32
    %c0_i32_0 = arith.constant 0 : i32
    %c0_i32_1 = arith.constant 0 : i32
    return %2, %c0_i32_0 : i32, i32
  }
  func.func @transform_2(%arg0: i32, %arg1: i32) -> (i32, i32) {
    %c1_i32 = arith.constant 1 : i32
    %0 = arith.muli %arg0, %c1_i32 : i32
    %1 = arith.addi %0, %arg1 : i32
    %c0_i32 = arith.constant 0 : i32
    %2 = arith.minsi %1, %c0_i32 : i32
    %c0_i32_0 = arith.constant 0 : i32
    %c0_i32_1 = arith.constant 0 : i32
    return %2, %c0_i32_0 : i32, i32
  }
  func.func @transform_3(%arg0: i32, %arg1: i32) -> (i32, i32) {
    %c1_i32 = arith.constant 1 : i32
    %0 = arith.muli %arg0, %c1_i32 : i32
    %1 = arith.addi %0, %arg1 : i32
    %c0_i32 = arith.constant 0 : i32
    %2 = arith.minsi %1, %c0_i32 : i32
    %c0_i32_0 = arith.constant 0 : i32
    %c0_i32_1 = arith.constant 0 : i32
    return %2, %c0_i32_0 : i32, i32
  }
  func.func @transform_4(%arg0: i32, %arg1: i32) -> (i32, i32) {
    %c0_i32 = arith.constant 0 : i32
    %c0_i32_0 = arith.constant 0 : i32
    return %arg0, %c0_i32 : i32, i32
  }
}

</mosaic_0001>

<bundles_post_ra>
// kernel: tpu_custom_call.1
= control target key start
LH: loop header
LB: loop body
LE: loop exit
PB: predicated region body
PF: predicated region fallthrough
CT: control target
= control target key end

     0   :  { %9 = vsyncpa [#allocation5], 0  ;;  %s882_s0 = inlined_call_operand.vmem [shape: f32[8,32], index: 0, kind: input, shape index: {}]   ;;  %s883_s1 = inlined_call_operand.vmem [shape: s32[8,1], index: 1, kind: input, shape index: {}]   ;;  %s884_s2 = inlined_call_operand.vmem [shape: f32[1,128], index: 2, kind: input, shape index: {}]   ;;  %s885_s3 = inlined_call_operand.vmem [shape: f32[1,128], index: 3, kind: input, shape index: {}]   ;;  %s886_s4 = inlined_call_operand.hbm [shape: f32[16,128], index: 4, kind: output, shape index: {}]  }
   0x1   :  { %11 = vsyncpa [#allocation5 + $0x1], 0  ;;  %s756_s15 = smov 0   ;;  %s758_s16 = smov 0  }
   0x2   :  { %s760_s17 = smov 0   ;;  %s762_s18 = smov 0  }
   0x3   :  { %s764_s19 = smov 0   ;;  %s766_s20 = smov 0  }
   0x4 LB: > { %s554_s21 = sadd.s32 4294967295, %s726_s20   ;;  %s555_s22 = sadd.s32 4294967294, %s726_s20   ;;  %s726_s20 = sphi %s766_s20, %s17_s20   ;;  %s722_s19 = sphi %s764_s19, %s893_s19   ;;  %s718_s18 = sphi %s762_s18, %s892_s18   ;;  %s714_s17 = sphi %s760_s17, %s891_s17   ;;  %s710_s16 = sphi %s758_s16, %s890_s16   ;;  %s706_s15 = sphi %s756_s15, %s889_s15  }
   0x5   : > { %s29_s23 = sadd.s32 1, %s722_s19  ;;  %s164_s24 = sadd.s32 1, %s714_s17 }
   0x6   : > { %p31_p0 = scmp.ge.s32.totalorder %s29_s23, 2  ;;  %p174_p1 = scmp.ne.s32.totalorder %s714_s17, %s710_s16 }
   0x7   : > { %p175_p2 = scmp.eq.s32.totalorder %s554_s21, 1  ;;  %p180_p3 = scmp.ne.s32.totalorder %s710_s16, %s706_s15 }
   0x8   : > { %s895_s23 = smov (%p31_p0, %s29_s23), 0  ;;  %p181_p5 = scmp.eq.s32.totalorder %s555_s22, 1 }
   0x9   : > { %p796_p4 = por %p175_p2, %p174_p1  ;;  %s161_s26 = ssub.s32 %s722_s19, %s895_s23 }
   0xa   : > { %p558_p6 = scmp.ge.s32.totalorder %s726_s20, 1  ;;  %p162_p7 = scmp.eq.s32.totalorder %s161_s26, 0 }
   0xb   : > { %p803_p8 = por %p181_p5, %p180_p3  ;;  %p249_p9 = scmp.lt.s32.totalorder %s726_s20, 3 }
   0xc   : > { %s809_s28 = scalar_select %p162_p7, %s714_s17, %s164_s24  }
   0xd   : > { %p250_p10 = pnand %p558_p6, %p249_p9 }
   0xe   : > { %p297_p11 = scmp.lt.s32.totalorder (!%p250_p10), %s718_s18, 0  ;;  %s574_s24 = sshll.u32 (!%p250_p10), %s718_s18, 3 }
   0xf   : > { %253 = sbr.rel (%p250_p10) target bundleno = 587 (0x24b), region = 36  ;;  %s293_s26 = sand.u32 (!%p250_p10), 1, %s710_s16  }
  0x10   : > { %s576_s6 = sshll.u32 (!%p250_p10), %s718_s18, 7  ;;  %s444_s12 = scalar_lea.sflag (!%p250_p10), [#allocation5], %s293_s26 }
  0x11   : > { %s455_s11 = scalar_lea.hbm (!%p250_p10), %s886_s4, %s576_s6  ;;  %s730_s14 = smov (!%p250_p10), [#allocation4]  }
  0x12   : > { %s654_s21 = sshll.u32 (!%p250_p10), %s730_s14, 4  ;;  %s655_s21 = int_to_ptr.vmem [resolvable:$false] %s654_s21 }
  0x14   : > { %s298_s29 = scalar_select %p297_p11, %s718_s18, 0  ;;  %vm350_vm0 = vcmask 261120   ;;  %v728_v2 = vmov 0   ;;  %v345_v16 = vlaneseq  ;;  %v389_v18 = vstv %s718_s18 }
  0x15   : > { %640 = vset.pattern.permute.xlu1 %v728_v2  ;;  %641 = vset.pattern.permute.xlu0 %v728_v2  ;;  %v729_v20 = vmov 0.0   ;;  %vm339_vm2 = vcmask 253952   ;;  %vm427_vm3 = vcmask 1040384   ;;  %v347_v36 = vstv %s574_s24  ;;  %s656_s18 = scalar_lea.vmem %s655_s21, 256 }
  0x16   : > { %s897_s29 = smov (!%p297_p11, %s298_s29), 0  ;;  %341 = vst [vmem:[#allocation3] sm:$0x1] %v729_v20  ;;  %v346_v21 = vshrl.u32 %v345_v16, 7  ;;  %340 = vst.msk [vmem:[#allocation2] sm:$0x1] %vm339_vm2, %v729_v20 }
  0x17   : > { %s563_s30 = sshll.u32 %s897_s29, 3  ;;  %s321_s13 = scalar_lea.vmem %s884_s2, %s897_s29  ;;  %v364_v34 = vand.u32 127, %v345_v16 }
  0x18   : > { %s302_s7 = scalar_lea.vmem %s882_s0, %s563_s30  ;;  %s312_s10 = scalar_lea.vmem %s883_s1, %s563_s30  ;;  %v387_v9 = vld [vmem:[%s321_s13] sm:$0x1]  ;;  %v390_v24 = vadd.s32 %v389_v18, %v346_v21  ;;  %v348_v39 = vadd.s32 %v347_v36, %v346_v21 }
  0x19   : > { %v819_v0 = vld [vmem:[%s302_s7] sm:$0xff]  ;;  %v395_v10 = vsub.f32 1.0, %v387_v9  ;;  %s330_s22 = scalar_lea.vmem %s885_s3, %s897_s29  ;;  %vm365_vm5 = vcmp.eq.s32.totalorder %v364_v34, 0  ;;  %s559_s29 = sshll.u32 %s293_s26, 3 }
  0x1a   : > { %v351_v1 = vsel %vm350_vm0, %v819_v0, -inf  ;;  %v343_v3 = vld [vmem:[%s312_s10] sm:$0xff]  ;;  %vm391_vm1 = vcmp.lt.s32.totalorder %v390_v24, 1  ;;  %vm349_vm6 = vcmp.lt.s32.totalorder %v348_v39, 8  ;;  %s295_s7 = scalar_lea.vmem [#allocation4], %s559_s29 }
  0x1b   : > { %352 = vmax.xlane.f32.xlu0 %v351_v1  ;;  %368 = vperm.xlu1 %640, %v343_v3   ;;  %v388_v14 = vld [vmem:[%s330_s22] sm:$0x1]  ;;  %s457_s8 = sshll.u32 %s295_s7, 4  ;;  %s458_s8 = int_to_ptr.vmem [resolvable:$true] %s457_s8 }
  0x1c   : > { %v400_v17 = vsub.f32 1.0, %v388_v14  ;;  %s650_s13 = scalar_lea.vmem %s458_s8, 128  ;;  %p657_p1 = scmp.lt.s32.totalorder %s458_s8, %s655_s21 }
  0x1d   : > { %v407_v28 = vld [vmem:[#allocation3] sm:$0x1]  ;;  %v376_v51 = vld [vmem:[#allocation2] sm:$0x1]  ;;  %p651_p12 = scmp.ne.s32.totalorder %s458_s8, %s650_s13  ;;  %p658_p2 = scmp.lt.s32.totalorder %s656_s18, %s650_s13 }
  0x1f   : > { %p652_p13 = pnand %p651_p12, %p796_p4  ;;  %p659_p3 = por %p658_p2, %p657_p1 }
  0x21   : > { %p653_p0 = pneg %p652_p13 }
  0x23   : > { %p660_p5 = pnand %p659_p3, %p653_p0 }
  0x96   : > { %v369_v35 = vpop.permute.xlu1 %368 }
  0x97   : > { %vm370_vm4 = vcmp.eq.s32.totalorder %v364_v34, %v369_v35 }
  0x98   : > { %v371_v41 = vsel %vm370_vm4, %v819_v0, 0.0 }
  0xa4   : > { %v353_v4 = vpop.xlane.xlu0 %352 }
  0xa5   : > { %v354_v5 = vsub.f32 %v819_v0, %v353_v4 }
  0xa7   : > { %v355_v6 = vmul.f32 1.442695, %v354_v5 }
  0xa9   : > { %642 = vpow2.f32 %v355_v6 }
  0xaa   : > { %644 = vlog2.f32 %v387_v9 }
  0xab   : > { %646 = vlog2.f32 %v395_v10 }
  0xb6   : > { %v643_v7 = vpop.eup %642 }
  0xb7   : > { %v357_v8 = vsel %vm350_vm0, %v643_v7, 0.0  ;;  %v645_v11 = vpop.eup %644 }
  0xb8   : > { %358 = vadd.xlane.f32.xlu0 %v357_v8  ;;  %v393_v12 = vmul.f32 0.6931472, %v645_v11  ;;  %v647_v13 = vpop.eup %646 }
  0xb9   : > { %v397_v19 = vmul.f32 0.6931472, %v647_v13 }
  0xba   : > { %v394_v15 = vmax.f32 %v393_v12, -100.0 }
  0xbb   : > { %v398_v23 = vmax.f32 %v397_v19, -100.0 }
  0xbc   : > { %v399_v22 = vmul.f32 %v394_v15, %v388_v14 }
  0xbd   : > { %v401_v25 = vmul.f32 %v400_v17, %v398_v23 }
  0xbf   : > { %v402_v26 = vadd.f32 %v401_v25, %v399_v22 }
  0xc1   : > { %v403_v27 = vsub.f32 0.0, %v402_v26 }
  0xc3   : > { %v406_v29 = vsel %vm391_vm1, %v403_v27, 0.0 }
  0xc4   : > { %v409_v30 = vadd.f32 %v407_v28, %v406_v29 }
  0xc6   : > { %410 = vst [vmem:[#allocation3] sm:$0x1] %v409_v30 }
  0xcd   : > { %v426_v31 = vld [vmem:[#allocation3] sm:$0x1] }
  0xce   : > { %v428_v32 = vsel %vm427_vm3, %v426_v31, 0.0 }
  0xcf   : > { %429 = vadd.xlane.f32.xlu0 %v428_v32 }
 0x141   : > { %v359_v33 = vpop.xlane.xlu0 %358 }
 0x142   : > { %648 = vlog2.f32 %v359_v33 }
 0x14f   : > { %v649_v37 = vpop.eup %648 }
 0x150   : > { %v361_v38 = vmul.f32 0.6931472, %v649_v37 }
 0x152   : > { %v362_v40 = vadd.f32 %v361_v38, %v353_v4 }
 0x154   : > { %v366_v42 = vsel %vm365_vm5, %v362_v40, 0.0 }
 0x155   : > { %v372_v43 = vsub.f32 %v366_v42, %v371_v41 }
 0x157   : > { %v375_v44 = vsel %vm349_vm6, %v372_v43, 0.0 }
 0x158   : > { %v377_v45 = vsel %vm350_vm0, %v375_v44, 0.0  ;;  %v430_v56 = vpop.xlane.xlu0 %429 }
 0x159   : > { %v378_v46 = vrot.slane %v377_v45, 4  ;;  %v431_v57 = vrot.slane %v430_v56, 4 }
 0x15b   : > { %v379_v47 = vadd.f32 %v378_v46, %v377_v45  ;;  %v432_v58 = vadd.f32 %v431_v57, %v430_v56 }
 0x15d   : > { %v380_v48 = vrot.slane %v379_v47, 2  ;;  %v433_v59 = vrot.slane %v432_v58, 2 }
 0x15f   : > { %v381_v49 = vadd.f32 %v380_v48, %v379_v47  ;;  %v434_v63 = vadd.f32 %v433_v59, %v432_v58 }
 0x161   : > { %v382_v50 = vrot.slane %v381_v49, 1  ;;  %v435_v2 = vrot.slane %v434_v63, 1 }
 0x163   : > { %v383_v52 = vadd.f32 %v382_v50, %v381_v49  ;;  %v436_v5 = vadd.f32 %v435_v2, %v434_v63 }
 0x165   : > { %v384_v53 = vadd.f32 %v383_v52, %v376_v51 }
 0x167   : > { %386 = vst.msk [vmem:[#allocation2] sm:$0x1] %vm339_vm2, %v384_v53 }
 0x16e   : > { %v414_v54 = vld [vmem:[#allocation2] sm:$0x1] }
 0x16f   : > { %v415_v55 = vsel %vm339_vm2, %v414_v54, 0.0 }
 0x170   : > { %416 = vadd.xlane.f32.xlu1 %v415_v55 }
 0x1f9   : > { %v417_v60 = vpop.xlane.xlu1 %416 }
 0x1fa   : > { %v418_v61 = vrot.slane %v417_v60, 4 }
 0x1fc   : > { %v419_v62 = vadd.f32 %v418_v61, %v417_v60 }
 0x1fe   : > { %v420_v0 = vrot.slane %v419_v62, 2 }
 0x200   : > { %v421_v1 = vadd.f32 %v420_v0, %v419_v62 }
 0x202   : > { %v422_v3 = vrot.slane %v421_v1, 1 }
 0x204   : > { %v423_v4 = vadd.f32 %v422_v3, %v421_v1 }
 0x206   : > { %579 = vpush %v423_v4 }
 0x207   : > { %581 = vpush %v436_v5 }
 0x237   : > { %s580_s30 = spop %579 }
 0x238   : > { %v425_v6 = vstv %s580_s30  ;;  %s582_s5 = spop %581 }
 0x239   : > { %v439_v7 = vmul.f32 0.125, %v425_v6  ;;  %v438_v8 = vstv %s582_s5 }
 0x23a   : > { %v440_v9 = vmul.f32 0.0078125, %v438_v8 }
 0x23c   : > { %v441_v10 = vadd.f32 %v440_v9, %v439_v7 }
 0x23e   : > { %442 = vst [vmem:[%s295_s7] sm:$0xff] %v441_v10 }
 0x23f   : > { %663 = shalt.err (!%p660_p5)
}
 0x240   : > { %s664_s22 = scalar_lea.hbm %s455_s11, 128  ;;  %s668_s29 = scalar_lea.hbm %s886_s4, 256 }
 0x241   : > { %p665_p6 = scmp.ne.s32.totalorder %s455_s11, %s664_s22  ;;  %p669_p10 = scmp.lt.s32.totalorder %s455_s11, %s886_s4 }
 0x242   : > { %p670_p11 = scmp.lt.s32.totalorder %s668_s29, %s664_s22 }
 0x243   : > { %p666_p7 = pnand %p665_p6, %p796_p4 }
 0x244   : > { %p671_p12 = por %p670_p11, %p669_p10 }
 0x245   : > { %p667_p9 = pneg %p666_p7 }
 0x247   : > { %p672_p13 = pnand %p671_p12, %p667_p9 }
 0x249   : > { %675 = shalt.err (!%p672_p13)
}
 0x24a   : > { %583 = dma.vmem_to_hbm [thread:$0]  (%p796_p4), %s458_s8, 128, %s455_s11, %s444_s12  }
 0x24b PF: > { %p589_p0 = scmp.ge.s32.totalorder %s726_s20, 2  ;;  %s469_s6 = sand.u32 1, %s706_s15  }
 0x24c   : > { %s470_s7 = scalar_lea.sflag [#allocation5], %s469_s6 }
 0x24d   : > { %p586_p1 = pnand %p589_p0, %p803_p8 }
 0x24f   : > { %p587_p2 = pneg %p586_p1 }
 0x251   : > { %701 = dma.done.wait (%p587_p2), %s470_s7, 128  }
 0x252   : > { %703 = vsyncadd (%p587_p2), %s470_s7, 4294967168  ;;  %s17_s20 = sadd.s32 1, %s726_s20   ;;  %s889_s15 = smov %s710_s16 }
 0x253   : > { %p14_p3 = scmp.ge.s32.totalorder %s17_s20, 4   ;;  %s890_s16 = smov %s714_s17 }
 0x254   : > { %s891_s17 = smov %s809_s28  ;;  %s892_s18 = smov %s722_s19 }
 0x255   : > { %s893_s19 = smov %s895_s23  ;;  %16 = sbr.rel (!%p14_p3) target bundleno = 4 (0x4), region = 88 }
 0x25a   :  { %475 = vsyncpa [#allocation5], 1 }
 0x25b   :  { %477 = vsyncpa [#allocation5 + $0x1], 1 }

</bundles_post_ra>
